<compile_context>
chip_gen: v5e
topology: v5e:2x2
jax: 0.10.0
libtpu: 0.0.40
codegen_flags: <defaults>
</compile_context>

<pallas_src>
import jax
import jax.numpy as jnp
from jax.experimental import pallas as pl
from jax.experimental.pallas import tpu as pltpu


def _round_up(x, n):
    return (x + n - 1) // n * n


def _vmem_budget_bytes():
    # Generation-aware VMEM cap: per-TensorCore capacity minus ~12.5% headroom
    # (-> ~56 MiB on v7x (64 MiB/TC), ~112 MiB on v5e/v6e (128 MiB)).
    try:
        cap = int(pltpu.get_tpu_info().vmem_capacity_bytes)
    except Exception:
        cap = 64 << 20  # conservative fallback (v7x-sized)
    return max(16 << 20, (cap // 8) * 7)


def _mlp_kernel(x_ref, w1_ref, b1_ref, w2_ref, b2_ref, w3_ref, b3_ref, o_ref):
    # Fused fc1 -> ReLU -> fc2 -> ReLU -> fc3. All three matmuls hit the MXU
    # with bf16 operands and f32 accumulation; bias add + ReLU run on the VPU
    # in f32.
    x = x_ref[...]
    h1 = jnp.dot(x, w1_ref[...], preferred_element_type=jnp.float32) + b1_ref[...]
    h1 = jnp.maximum(h1, 0.0).astype(x.dtype)
    h2 = jnp.dot(h1, w2_ref[...], preferred_element_type=jnp.float32) + b2_ref[...]
    h2 = jnp.maximum(h2, 0.0).astype(x.dtype)
    h3 = jnp.dot(h2, w3_ref[...], preferred_element_type=jnp.float32) + b3_ref[...]
    o_ref[...] = h3.astype(o_ref.dtype)


def pack_mlp_params(params, compute_dtype=jnp.bfloat16):
    """Pad weights to lane-dense (multiple-of-128) shapes and cast to the MXU
    compute dtype ONCE. Reuse the result across calls — this hoists the
    per-call weight padding/cast HBM traffic out of the forward path."""
    d_in = params["w1"].shape[0]
    d_out = params["w3"].shape[1]
    d_in_p = _round_up(d_in, 128)
    d_out_p = _round_up(d_out, 128)

    def pad_w(w, rows, cols):
        return jnp.pad(
            w, ((0, rows - w.shape[0]), (0, cols - w.shape[1]))
        ).astype(compute_dtype)

    def pad_b(b, cols):
        return jnp.pad(b, (0, cols - b.shape[0])).astype(jnp.float32).reshape(1, cols)

    return {
        "_packed": True,
        "compute_dtype": compute_dtype,
        "d_in": d_in,
        "d_out": d_out,
        "d_in_p": d_in_p,
        "d_out_p": d_out_p,
        "w1": pad_w(params["w1"], d_in_p, d_in_p),
        "b1": pad_b(params["b1"], d_in_p),
        "w2": pad_w(params["w2"], d_in_p, d_in_p),
        "b2": pad_b(params["b2"], d_in_p),
        "w3": pad_w(params["w3"], d_in_p, d_out_p),
        "b3": pad_b(params["b3"], d_out_p),
    }


def mlp_pallas(x, params, *, tm_max=1024, compute_dtype=jnp.bfloat16, out_dtype=None):
    """x: (..., input_dim). params: raw dict of w1,b1,w2,b2,w3,b3 ([in,out]
    weights) or the output of pack_mlp_params (preferred: pack once, reuse)."""
    if not isinstance(params, dict) or not params.get("_packed", False):
        params = pack_mlp_params(params, compute_dtype=compute_dtype)
    compute_dtype = params["compute_dtype"]
    d_in, d_out = params["d_in"], params["d_out"]
    d_in_p, d_out_p = params["d_in_p"], params["d_out_p"]
    out_dtype = x.dtype if out_dtype is None else out_dtype

    orig_shape = x.shape
    assert orig_shape[-1] == d_in, "trailing dim of x must equal input_dim"
    x2d = x.reshape(-1, d_in)
    m = x2d.shape[0]

    itm = jnp.dtype(compute_dtype).itemsize
    out_itm = jnp.dtype(out_dtype).itemsize

    weight_bytes = (2 * d_in_p * d_in_p + d_in_p * d_out_p) * itm  # single-buffered
    bias_bytes = (2 * d_in_p + d_out_p) * 4
    vmem_budget = _vmem_budget_bytes()

    # ---- row-tile selection (VMEM- and megacore-aware) ----------------------
    per_row = (
        2 * d_in_p * itm                  # double-buffered x tile
        + 2 * d_out_p * out_itm           # double-buffered out tile
        + 3 * max(d_in_p, d_out_p) * 4    # f32 intermediates
    )
    avail = vmem_budget - (weight_bytes + bias_bytes)
    if avail < per_row * 8:
        # Resident weights (nearly) exhaust this generation's VMEM.
        # TODO(synk): switch to the K-tiled accumulator scheme here.
        avail = per_row * 8
    tm = min(tm_max, (avail // per_row) // 8 * 8)
    m_ceil = _round_up(m, 8)
    tm = max(8, min(tm, m_ceil))
    if m_ceil >= 128 and tm >= m_ceil:
        # Keep >= 2 grid steps so megacore can shard the "parallel" axis.
        tm = max(8, _round_up((m_ceil + 1) // 2, 8))
    m_p = _round_up(m, tm)
    grid = (m_p // tm,)

    # ---- activation staging: pad only when actually needed ------------------
    if m_p == m and d_in_p == d_in:
        xp = x2d.astype(compute_dtype)
    else:
        xp = jnp.pad(x2d, ((0, m_p - m), (0, d_in_p - d_in))).astype(compute_dtype)

    # ---- scheduler hint + VMEM budget ---------------------------------------
    flops = 2 * m_p * (2 * d_in_p * d_in_p + d_in_p * d_out_p)
    bytes_accessed = (
        m_p * d_in_p * itm            # x
        + weight_bytes + bias_bytes   # params
        + m_p * d_out_p * out_itm     # out
    )
    est_vmem = weight_bytes + bias_bytes + tm * per_row
    vmem_limit = int(min(vmem_budget, max(32 << 20, int(est_vmem * 1.25))))

    def run(weight_mode):
        def wspec(shape):
            # Grid-invariant parameter tile (always block (0, 0)).
            return pl.BlockSpec(shape, lambda i: (0, 0), pipeline_mode=weight_mode)

        in_specs = [
            pl.BlockSpec((tm, d_in_p), lambda i: (i, 0)),  # x tile
            wspec((d_in_p, d_in_p)),                       # w1 (resident)
            wspec((1, d_in_p)),                            # b1
            wspec((d_in_p, d_in_p)),                       # w2 (resident)
            wspec((1, d_in_p)),                            # b2
            wspec((d_in_p, d_out_p)),                      # w3 (resident)
            wspec((1, d_out_p)),                           # b3
        ]
        return pl.pallas_call(
            _mlp_kernel,
            out_shape=jax.ShapeDtypeStruct((m_p, d_out_p), out_dtype),
            grid_spec=pltpu.PrefetchScalarGridSpec(
                num_scalar_prefetch=0,
                grid=grid,
                in_specs=in_specs,
                out_specs=pl.BlockSpec((tm, d_out_p), lambda i: (i, 0)),
            ),
            compiler_params=pltpu.CompilerParams(
                dimension_semantics=("parallel",),
                vmem_limit_bytes=vmem_limit,
            ),
            cost_estimate=pl.CostEstimate(
                flops=flops, transcendentals=0, bytes_accessed=bytes_accessed
            ),
        )(xp, params["w1"], params["b1"], params["w2"], params["b2"],
          params["w3"], params["b3"])

    try:
        # Single-buffer the grid-invariant weights (they never change block).
        out = run(pl.Buffered(1))
    except Exception:
        # Fallback: default double-buffering if this jax build rejects
        # Buffered(1) on pipelined inputs.
        out = run(None)

    if m_p != m or d_out_p != d_out:
        out = out[:m, :d_out]
    return out.reshape(*orig_shape[:-1], d_out)


def init_mlp_params(key, input_dim, output_dim, dtype=jnp.float32):
    """Deterministic init mimicking nn.Linear (uniform +-1/sqrt(fan_in)).
    Weights are stored pre-transposed as [in, out] so the kernel does x @ W."""
    ks = jax.random.split(key, 6)

    def lin(kw, kb, fan_in, fan_out):
        bound = 1.0 / (fan_in ** 0.5)
        w = jax.random.uniform(kw, (fan_in, fan_out), dtype, -bound, bound)
        b = jax.random.uniform(kb, (fan_out,), dtype, -bound, bound)
        return w, b

    w1, b1 = lin(ks[0], ks[1], input_dim, input_dim)
    w2, b2 = lin(ks[2], ks[3], input_dim, input_dim)
    w3, b3 = lin(ks[4], ks[5], input_dim, output_dim)
    return {"w1": w1, "b1": b1, "w2": w2, "b2": b2, "w3": w3, "b3": b3}


def mlp_reference(x, params):
    h = jnp.maximum(x @ params["w1"] + params["b1"], 0.0)
    h = jnp.maximum(h @ params["w2"] + params["b2"], 0.0)
    return h @ params["w3"] + params["b3"]  # dropout(p=0.0) == identity


if __name__ == "__main__":
    key = jax.random.PRNGKey(0)
    k_x, k_p = jax.random.split(key)

    batch, seq, input_dim, output_dim = 2, 8, 32, 16
    x = jax.random.normal(k_x, (batch, seq, input_dim), dtype=jnp.float32)
    params = init_mlp_params(k_p, input_dim, output_dim)

    # Pack (pad + cast) the weights once; reuse across forward calls.
    packed = pack_mlp_params(params)

    out = mlp_pallas(x, packed)
    out = jax.block_until_ready(out)

    ref = mlp_reference(x, params)
    assert out.shape == (batch, seq, output_dim)
    # bf16 matmul operands (f32 accumulation) -> loosened tolerance vs f32 ref.
    assert jnp.allclose(out, ref, atol=1e-1, rtol=1e-1), "mismatch vs reference"

    print("KERNEL_OK")
</pallas_src>

<mosaic_0001>
module attributes {stable_mosaic.version = 11 : i64} {
  func.func @_mlp_kernel(%arg0: i32, %arg1: memref<16x128xbf16, #tpu.memory_space<vmem>>, %arg2: memref<128x128xbf16, #tpu.memory_space<vmem>>, %arg3: memref<1x128xf32, #tpu.memory_space<vmem>>, %arg4: memref<128x128xbf16, #tpu.memory_space<vmem>>, %arg5: memref<1x128xf32, #tpu.memory_space<vmem>>, %arg6: memref<128x128xbf16, #tpu.memory_space<vmem>>, %arg7: memref<1x128xf32, #tpu.memory_space<vmem>>, %arg8: memref<16x128xf32, #tpu.memory_space<vmem>>) attributes {dimension_semantics = [#tpu.dimension_semantics<parallel>], iteration_bounds = array<i64: 1>, scalar_prefetch = 0 : i64, scratch_operands = 0 : i64, tpu.core_type = #tpu.core_type<tc>, window_params = [{transform_indices = @transform_0, window_bounds = array<i64: 16, 128>}, {pipeline_mode = #tpu.pipeline_mode<synchronous>, transform_indices = @transform_1, window_bounds = array<i64: 128, 128>}, {pipeline_mode = #tpu.pipeline_mode<synchronous>, transform_indices = @transform_2, window_bounds = array<i64: 1, 128>}, {pipeline_mode = #tpu.pipeline_mode<synchronous>, transform_indices = @transform_3, window_bounds = array<i64: 128, 128>}, {pipeline_mode = #tpu.pipeline_mode<synchronous>, transform_indices = @transform_4, window_bounds = array<i64: 1, 128>}, {pipeline_mode = #tpu.pipeline_mode<synchronous>, transform_indices = @transform_5, window_bounds = array<i64: 128, 128>}, {pipeline_mode = #tpu.pipeline_mode<synchronous>, transform_indices = @transform_6, window_bounds = array<i64: 1, 128>}, {transform_indices = @transform_7, window_bounds = array<i64: 16, 128>}]} {
    %c0 = arith.constant 0 : index
    %c0_0 = arith.constant 0 : index
    %0 = vector.load %arg1[%c0, %c0_0] : memref<16x128xbf16, #tpu.memory_space<vmem>>, vector<16x128xbf16>
    %c0_1 = arith.constant 0 : index
    %c0_2 = arith.constant 0 : index
    %1 = vector.load %arg2[%c0_1, %c0_2] : memref<128x128xbf16, #tpu.memory_space<vmem>>, vector<128x128xbf16>
    %cst = arith.constant dense<0.000000e+00> : vector<16x128xf32>
    %2 = tpu.matmul %0, %1, %cst {dimension_numbers = #tpu.dot_dimension_numbers<[1], [0], [0], [1], [0, 0, 1, 1], [], []>} : vector<16x128xbf16>, vector<128x128xbf16>, vector<16x128xf32> -> vector<16x128xf32>
    %c0_3 = arith.constant 0 : index
    %c0_4 = arith.constant 0 : index
    %3 = vector.load %arg3[%c0_3, %c0_4] : memref<1x128xf32, #tpu.memory_space<vmem>>, vector<1x128xf32>
    %4 = vector.broadcast %3 : vector<1x128xf32> to vector<16x128xf32>
    %5 = arith.addf %2, %4 : vector<16x128xf32>
    %cst_5 = arith.constant 0.000000e+00 : f32
    %6 = vector.broadcast %cst_5 : f32 to vector<16x128xf32>
    %7 = arith.maximumf %5, %6 : vector<16x128xf32>
    %8 = arith.truncf %7 : vector<16x128xf32> to vector<16x128xbf16>
    %c0_6 = arith.constant 0 : index
    %c0_7 = arith.constant 0 : index
    %9 = vector.load %arg4[%c0_6, %c0_7] : memref<128x128xbf16, #tpu.memory_space<vmem>>, vector<128x128xbf16>
    %cst_8 = arith.constant dense<0.000000e+00> : vector<16x128xf32>
    %10 = tpu.matmul %8, %9, %cst_8 {dimension_numbers = #tpu.dot_dimension_numbers<[1], [0], [0], [1], [0, 0, 1, 1], [], []>} : vector<16x128xbf16>, vector<128x128xbf16>, vector<16x128xf32> -> vector<16x128xf32>
    %c0_9 = arith.constant 0 : index
    %c0_10 = arith.constant 0 : index
    %11 = vector.load %arg5[%c0_9, %c0_10] : memref<1x128xf32, #tpu.memory_space<vmem>>, vector<1x128xf32>
    %12 = vector.broadcast %11 : vector<1x128xf32> to vector<16x128xf32>
    %13 = arith.addf %10, %12 : vector<16x128xf32>
    %cst_11 = arith.constant 0.000000e+00 : f32
    %14 = vector.broadcast %cst_11 : f32 to vector<16x128xf32>
    %15 = arith.maximumf %13, %14 : vector<16x128xf32>
    %16 = arith.truncf %15 : vector<16x128xf32> to vector<16x128xbf16>
    %c0_12 = arith.constant 0 : index
    %c0_13 = arith.constant 0 : index
    %17 = vector.load %arg6[%c0_12, %c0_13] : memref<128x128xbf16, #tpu.memory_space<vmem>>, vector<128x128xbf16>
    %cst_14 = arith.constant dense<0.000000e+00> : vector<16x128xf32>
    %18 = tpu.matmul %16, %17, %cst_14 {dimension_numbers = #tpu.dot_dimension_numbers<[1], [0], [0], [1], [0, 0, 1, 1], [], []>} : vector<16x128xbf16>, vector<128x128xbf16>, vector<16x128xf32> -> vector<16x128xf32>
    %c0_15 = arith.constant 0 : index
    %c0_16 = arith.constant 0 : index
    %19 = vector.load %arg7[%c0_15, %c0_16] : memref<1x128xf32, #tpu.memory_space<vmem>>, vector<1x128xf32>
    %20 = vector.broadcast %19 : vector<1x128xf32> to vector<16x128xf32>
    %21 = arith.addf %18, %20 : vector<16x128xf32>
    %c0_17 = arith.constant 0 : index
    %c0_18 = arith.constant 0 : index
    %22 = vector.load %arg8[%c0_17, %c0_18] : memref<16x128xf32, #tpu.memory_space<vmem>>, vector<16x128xf32>
    tpu.vector_store %arg8[%c0_17, %c0_18], %21 {strides = array<i32>} : memref<16x128xf32, #tpu.memory_space<vmem>>, vector<16x128xf32>,
    return
  }
  func.func @transform_0(%arg0: i32) -> (i32, i32) {
    %c0_i32 = arith.constant 0 : i32
    %c0_i32_0 = arith.constant 0 : i32
    return %arg0, %c0_i32 : i32, i32
  }
  func.func @transform_1(%arg0: i32) -> (i32, i32) {
    %c0_i32 = arith.constant 0 : i32
    %c0_i32_0 = arith.constant 0 : i32
    %c0_i32_1 = arith.constant 0 : i32
    return %c0_i32, %c0_i32_0 : i32, i32
  }
  func.func @transform_2(%arg0: i32) -> (i32, i32) {
    %c0_i32 = arith.constant 0 : i32
    %c0_i32_0 = arith.constant 0 : i32
    %c0_i32_1 = arith.constant 0 : i32
    return %c0_i32, %c0_i32_0 : i32, i32
  }
  func.func @transform_3(%arg0: i32) -> (i32, i32) {
    %c0_i32 = arith.constant 0 : i32
    %c0_i32_0 = arith.constant 0 : i32
    %c0_i32_1 = arith.constant 0 : i32
    return %c0_i32, %c0_i32_0 : i32, i32
  }
  func.func @transform_4(%arg0: i32) -> (i32, i32) {
    %c0_i32 = arith.constant 0 : i32
    %c0_i32_0 = arith.constant 0 : i32
    %c0_i32_1 = arith.constant 0 : i32
    return %c0_i32, %c0_i32_0 : i32, i32
  }
  func.func @transform_5(%arg0: i32) -> (i32, i32) {
    %c0_i32 = arith.constant 0 : i32
    %c0_i32_0 = arith.constant 0 : i32
    %c0_i32_1 = arith.constant 0 : i32
    return %c0_i32, %c0_i32_0 : i32, i32
  }
  func.func @transform_6(%arg0: i32) -> (i32, i32) {
    %c0_i32 = arith.constant 0 : i32
    %c0_i32_0 = arith.constant 0 : i32
    %c0_i32_1 = arith.constant 0 : i32
    return %c0_i32, %c0_i32_0 : i32, i32
  }
  func.func @transform_7(%arg0: i32) -> (i32, i32) {
    %c0_i32 = arith.constant 0 : i32
    %c0_i32_0 = arith.constant 0 : i32
    return %arg0, %c0_i32 : i32, i32
  }
}

module attributes {stable_mosaic.version = 11 : i64} {
  func.func @_mlp_kernel(%arg0: i32, %arg1: memref<16x128xbf16, #tpu.memory_space<vmem>>, %arg2: memref<128x128xbf16, #tpu.memory_space<vmem>>, %arg3: memref<1x128xf32, #tpu.memory_space<vmem>>, %arg4: memref<128x128xbf16, #tpu.memory_space<vmem>>, %arg5: memref<1x128xf32, #tpu.memory_space<vmem>>, %arg6: memref<128x128xbf16, #tpu.memory_space<vmem>>, %arg7: memref<1x128xf32, #tpu.memory_space<vmem>>, %arg8: memref<16x128xf32, #tpu.memory_space<vmem>>) attributes {dimension_semantics = [#tpu.dimension_semantics<parallel>], iteration_bounds = array<i64: 1>, scalar_prefetch = 0 : i64, scratch_operands = 0 : i64, tpu.core_type = #tpu.core_type<tc>, window_params = [{transform_indices = @transform_0, window_bounds = array<i64: 16, 128>}, {pipeline_mode = #tpu.pipeline_mode<synchronous>, transform_indices = @transform_1, window_bounds = array<i64: 128, 128>}, {pipeline_mode = #tpu.pipeline_mode<synchronous>, transform_indices = @transform_2, window_bounds = array<i64: 1, 128>}, {pipeline_mode = #tpu.pipeline_mode<synchronous>, transform_indices = @transform_3, window_bounds = array<i64: 128, 128>}, {pipeline_mode = #tpu.pipeline_mode<synchronous>, transform_indices = @transform_4, window_bounds = array<i64: 1, 128>}, {pipeline_mode = #tpu.pipeline_mode<synchronous>, transform_indices = @transform_5, window_bounds = array<i64: 128, 128>}, {pipeline_mode = #tpu.pipeline_mode<synchronous>, transform_indices = @transform_6, window_bounds = array<i64: 1, 128>}, {transform_indices = @transform_7, window_bounds = array<i64: 16, 128>}]} {
    %c0 = arith.constant 0 : index
    %c0_0 = arith.constant 0 : index
    %0 = vector.load %arg1[%c0, %c0_0] : memref<16x128xbf16, #tpu.memory_space<vmem>>, vector<16x128xbf16>
    %c0_1 = arith.constant 0 : index
    %c0_2 = arith.constant 0 : index
    %1 = vector.load %arg2[%c0_1, %c0_2] : memref<128x128xbf16, #tpu.memory_space<vmem>>, vector<128x128xbf16>
    %cst = arith.constant dense<0.000000e+00> : vector<16x128xf32>
    %2 = tpu.matmul %0, %1, %cst {dimension_numbers = #tpu.dot_dimension_numbers<[1], [0], [0], [1], [0, 0, 1, 1], [], []>} : vector<16x128xbf16>, vector<128x128xbf16>, vector<16x128xf32> -> vector<16x128xf32>
    %c0_3 = arith.constant 0 : index
    %c0_4 = arith.constant 0 : index
    %3 = vector.load %arg3[%c0_3, %c0_4] : memref<1x128xf32, #tpu.memory_space<vmem>>, vector<1x128xf32>
    %4 = vector.broadcast %3 : vector<1x128xf32> to vector<16x128xf32>
    %5 = arith.addf %2, %4 : vector<16x128xf32>
    %cst_5 = arith.constant 0.000000e+00 : f32
    %6 = vector.broadcast %cst_5 : f32 to vector<16x128xf32>
    %7 = arith.maximumf %5, %6 : vector<16x128xf32>
    %8 = arith.truncf %7 : vector<16x128xf32> to vector<16x128xbf16>
    %c0_6 = arith.constant 0 : index
    %c0_7 = arith.constant 0 : index
    %9 = vector.load %arg4[%c0_6, %c0_7] : memref<128x128xbf16, #tpu.memory_space<vmem>>, vector<128x128xbf16>
    %cst_8 = arith.constant dense<0.000000e+00> : vector<16x128xf32>
    %10 = tpu.matmul %8, %9, %cst_8 {dimension_numbers = #tpu.dot_dimension_numbers<[1], [0], [0], [1], [0, 0, 1, 1], [], []>} : vector<16x128xbf16>, vector<128x128xbf16>, vector<16x128xf32> -> vector<16x128xf32>
    %c0_9 = arith.constant 0 : index
    %c0_10 = arith.constant 0 : index
    %11 = vector.load %arg5[%c0_9, %c0_10] : memref<1x128xf32, #tpu.memory_space<vmem>>, vector<1x128xf32>
    %12 = vector.broadcast %11 : vector<1x128xf32> to vector<16x128xf32>
    %13 = arith.addf %10, %12 : vector<16x128xf32>
    %cst_11 = arith.constant 0.000000e+00 : f32
    %14 = vector.broadcast %cst_11 : f32 to vector<16x128xf32>
    %15 = arith.maximumf %13, %14 : vector<16x128xf32>
    %16 = arith.truncf %15 : vector<16x128xf32> to vector<16x128xbf16>
    %c0_12 = arith.constant 0 : index
    %c0_13 = arith.constant 0 : index
    %17 = vector.load %arg6[%c0_12, %c0_13] : memref<128x128xbf16, #tpu.memory_space<vmem>>, vector<128x128xbf16>
    %cst_14 = arith.constant dense<0.000000e+00> : vector<16x128xf32>
    %18 = tpu.matmul %16, %17, %cst_14 {dimension_numbers = #tpu.dot_dimension_numbers<[1], [0], [0], [1], [0, 0, 1, 1], [], []>} : vector<16x128xbf16>, vector<128x128xbf16>, vector<16x128xf32> -> vector<16x128xf32>
    %c0_15 = arith.constant 0 : index
    %c0_16 = arith.constant 0 : index
    %19 = vector.load %arg7[%c0_15, %c0_16] : memref<1x128xf32, #tpu.memory_space<vmem>>, vector<1x128xf32>
    %20 = vector.broadcast %19 : vector<1x128xf32> to vector<16x128xf32>
    %21 = arith.addf %18, %20 : vector<16x128xf32>
    %c0_17 = arith.constant 0 : index
    %c0_18 = arith.constant 0 : index
    %22 = vector.load %arg8[%c0_17, %c0_18] : memref<16x128xf32, #tpu.memory_space<vmem>>, vector<16x128xf32>
    tpu.vector_store %arg8[%c0_17, %c0_18], %21 {strides = array<i32>} : memref<16x128xf32, #tpu.memory_space<vmem>>, vector<16x128xf32>,
    return
  }
  func.func @transform_0(%arg0: i32) -> (i32, i32) {
    %c0_i32 = arith.constant 0 : i32
    %c0_i32_0 = arith.constant 0 : i32
    return %arg0, %c0_i32 : i32, i32
  }
  func.func @transform_1(%arg0: i32) -> (i32, i32) {
    %c0_i32 = arith.constant 0 : i32
    %c0_i32_0 = arith.constant 0 : i32
    %c0_i32_1 = arith.constant 0 : i32
    return %c0_i32, %c0_i32_0 : i32, i32
  }
  func.func @transform_2(%arg0: i32) -> (i32, i32) {
    %c0_i32 = arith.constant 0 : i32
    %c0_i32_0 = arith.constant 0 : i32
    %c0_i32_1 = arith.constant 0 : i32
    return %c0_i32, %c0_i32_0 : i32, i32
  }
  func.func @transform_3(%arg0: i32) -> (i32, i32) {
    %c0_i32 = arith.constant 0 : i32
    %c0_i32_0 = arith.constant 0 : i32
    %c0_i32_1 = arith.constant 0 : i32
    return %c0_i32, %c0_i32_0 : i32, i32
  }
  func.func @transform_4(%arg0: i32) -> (i32, i32) {
    %c0_i32 = arith.constant 0 : i32
    %c0_i32_0 = arith.constant 0 : i32
    %c0_i32_1 = arith.constant 0 : i32
    return %c0_i32, %c0_i32_0 : i32, i32
  }
  func.func @transform_5(%arg0: i32) -> (i32, i32) {
    %c0_i32 = arith.constant 0 : i32
    %c0_i32_0 = arith.constant 0 : i32
    %c0_i32_1 = arith.constant 0 : i32
    return %c0_i32, %c0_i32_0 : i32, i32
  }
  func.func @transform_6(%arg0: i32) -> (i32, i32) {
    %c0_i32 = arith.constant 0 : i32
    %c0_i32_0 = arith.constant 0 : i32
    %c0_i32_1 = arith.constant 0 : i32
    return %c0_i32, %c0_i32_0 : i32, i32
  }
  func.func @transform_7(%arg0: i32) -> (i32, i32) {
    %c0_i32 = arith.constant 0 : i32
    %c0_i32_0 = arith.constant 0 : i32
    return %arg0, %c0_i32 : i32, i32
  }
}

</mosaic_0001>

<bundles_post_ra>
// kernel: tpu_custom_call.1
= control target key start
LH: loop header
LB: loop body
LE: loop exit
PB: predicated region body
PF: predicated region fallthrough
CT: control target
= control target key end

     0   :  { %12 = vsyncpa [#allocation3], 0  ;;  %s711_s0 = inlined_call_operand.hbm [shape: bf16[16,128], index: 0, kind: input, shape index: {}]   ;;  %s712_s1 = inlined_call_operand.hbm [shape: bf16[128,128], index: 1, kind: input, shape index: {}]   ;;  %s713_s2 = inlined_call_operand.vmem [shape: f32[1,128], index: 2, kind: input, shape index: {}]   ;;  %s714_s3 = inlined_call_operand.hbm [shape: bf16[128,128], index: 3, kind: input, shape index: {}]   ;;  %s715_s4 = inlined_call_operand.vmem [shape: f32[1,128], index: 4, kind: input, shape index: {}]   ;;  %s716_s5 = inlined_call_operand.hbm [shape: bf16[128,128], index: 5, kind: input, shape index: {}]   ;;  %s717_s6 = inlined_call_operand.vmem [shape: f32[1,128], index: 6, kind: input, shape index: {}]   ;;  %s718_s7 = inlined_call_operand.hbm [shape: f32[16,128], index: 7, kind: output, shape index: {}]  }
   0x1   :  { %13 = vsyncpa [#allocation6], 0 }
   0x2   :  { %14 = vsyncpa [#allocation9], 0 }
   0x3   :  { %15 = vsyncpa [#allocation4], 0  ;;  %s33_s26 = sshll.u32 %s712_s1, 4  ;;  %s638_s27 = smov [#allocation5]   ;;  %s34_s26 = int_to_ptr.hbm [resolvable:$true] %s33_s26 }
   0x4   :  { %s35_s28 = sshll.u32 %s638_s27, 4  ;;  %s20_s8 = sshll.u32 %s711_s0, 4  ;;  %s36_s28 = int_to_ptr.vmem [resolvable:$true] %s35_s28  ;;  %s21_s8 = int_to_ptr.hbm [resolvable:$true] %s20_s8 }
   0x5   :  { %s639_s9 = smov 64   ;;  %s640_s10 = smov 4  }
   0x6   :  { %41 = dma.hbm_to_vmem [thread:$0]  %s34_s26, 1024, %s36_s28, [#allocation6], %s639_s9, %s639_s9, %s640_s10  }
   0x7   :  { %s641_s11 = smov [#allocation2]   ;;  %s48_s15 = sshll.u32 %s714_s3, 4  ;;  %s49_s15 = int_to_ptr.hbm [resolvable:$true] %s48_s15 }
   0x8   :  { %s22_s12 = sshll.u32 %s641_s11, 4  ;;  %s63_s17 = sshll.u32 %s716_s5, 4  ;;  %s23_s12 = int_to_ptr.vmem [resolvable:$true] %s22_s12  ;;  %s64_s17 = int_to_ptr.hbm [resolvable:$true] %s63_s17 }
   0x9   :  { %28 = dma.hbm_to_vmem [thread:$0]  %s21_s8, 128, %s23_s12, [#allocation3], %s639_s9, %s639_s9, %s640_s10  }
   0xa   :  { %s642_s18 = smov [#allocation7]   ;;  %s643_s0 = smov [#allocation8]  }
   0xb   :  { %s50_s19 = sshll.u32 %s642_s18, 4  ;;  %s65_s20 = sshll.u32 %s643_s0, 4  ;;  %s51_s19 = int_to_ptr.vmem [resolvable:$true] %s50_s19  ;;  %s66_s20 = int_to_ptr.vmem [resolvable:$true] %s65_s20 }
   0xc   :  { %56 = dma.hbm_to_vmem [thread:$0]  %s49_s15, 1024, %s51_s19, [#allocation6], %s639_s9, %s639_s9, %s640_s10  }
   0xd   :  { %71 = dma.hbm_to_vmem [thread:$0]  %s64_s17, 1024, %s66_s20, [#allocation9], %s639_s9, %s639_s9, %s640_s10  }
   0xe   :  { %630 = dma.done.wait [#allocation3], 128  }
   0xf   :  { %631 = vsyncadd [#allocation3], 4294967168 }
  0x10   :  { %632 = dma.done.wait [#allocation6], 2048  }
  0x11   :  { %633 = vsyncadd [#allocation6], 4294965248 }
  0x12   :  { %634 = dma.done.wait [#allocation9], 1024  }
  0x13   :  { %635 = vsyncadd [#allocation9], 4294966272  ;;  %v481_v0 = vld [vmem:[#allocation5 + $0x38] sm:$0xff]  ;;  %v480_v1 = vld [vmem:[#allocation5 + $0x30] sm:$0xff]  ;;  %s644_s24 = smov [#allocation10]   ;;  %s645_s28 = smov 128  }
  0x14   :  { %166 = vmatpush.bf16.msra.mxu0 %v481_v0  ;;  %v489_v2 = vld [vmem:[#allocation7 + $0x38] sm:$0xff]  ;;  %v488_v3 = vld [vmem:[#allocation7 + $0x30] sm:$0xff]  ;;  %v479_v4 = vld [vmem:[#allocation5 + $0x28] sm:$0xff]  ;;  %s356_s25 = sshll.u32 %s644_s24, 4  ;;  %s646_s29 = smov 8   ;;  %s357_s25 = int_to_ptr.vmem [resolvable:$true] %s356_s25 }
  0x15   :  { %251 = vmatpush.bf16.msra.mxu1 %v489_v2  ;;  %v487_v5 = vld [vmem:[#allocation7 + $0x28] sm:$0xff]  ;;  %v478_v6 = vld [vmem:[#allocation5 + $0x20] sm:$0xff]  ;;  %v477_v8 = vld [vmem:[#allocation5 + $0x18] sm:$0xff] }
  0x16   :  { %v486_v7 = vld [vmem:[#allocation7 + $0x20] sm:$0xff]  ;;  %v476_v9 = vld [vmem:[#allocation5 + $0x10] sm:$0xff]  ;;  %v475_v10 = vld [vmem:[#allocation5 + $0x8] sm:$0xff] }
  0x17   :  { %v474_v11 = vld [vmem:[#allocation5] sm:$0xff]  ;;  %v473_v12 = vld [vmem:[#allocation2] sm:$0xff]  ;;  %v484_v14 = vld [vmem:[#allocation7 + $0x10] sm:$0xff] }
  0x18   :  { %167 = vmatpush.bf16.msra.mxu0 %v480_v1  ;;  %v485_v13 = vld [vmem:[#allocation7 + $0x18] sm:$0xff]  ;;  %v483_v15 = vld [vmem:[#allocation7 + $0x8] sm:$0xff]  ;;  %v482_v16 = vld [vmem:[#allocation7] sm:$0xff] }
  0x19   :  { %252 = vmatpush.bf16.msra.mxu1 %v488_v3  ;;  %v497_v17 = vld [vmem:[#allocation8 + $0x38] sm:$0xff]  ;;  %v496_v18 = vld [vmem:[#allocation8 + $0x30] sm:$0xff]  ;;  %v495_v19 = vld [vmem:[#allocation8 + $0x28] sm:$0xff] }
  0x1a   :  { %336 = vmatpush.bf16.msra.mxu2 %v497_v17  ;;  %v494_v20 = vld [vmem:[#allocation8 + $0x20] sm:$0xff]  ;;  %v507_v22 = vld [vmem:[%s713_s2] ss:$0 sm:$0xff]  ;;  %v492_v30 = vld [vmem:[#allocation8 + $0x10] sm:$0xff] }
  0x1b   :  { %v493_v29 = vld [vmem:[#allocation8 + $0x18] sm:$0xff]  ;;  %v491_v31 = vld [vmem:[#allocation8 + $0x8] sm:$0xff]  ;;  %v490_v32 = vld [vmem:[#allocation8] sm:$0xff] }
  0x1c   :  { %168 = vmatpush.bf16.msra.mxu0 %v479_v4  ;;  %v508_v34 = vld [vmem:[%s715_s4] ss:$0 sm:$0xff]  ;;  %s358_s4 = sshll.u32 %s718_s7, 4  ;;  %s359_s4 = int_to_ptr.hbm [resolvable:$true] %s358_s4 }
  0x1d   :  { %253 = vmatpush.bf16.msra.mxu1 %v487_v5  ;;  %v509_v41 = vld [vmem:[%s717_s6] ss:$0 sm:$0xff] }
  0x1e   :  { %337 = vmatpush.bf16.msra.mxu2 %v496_v18 }
  0x20   :  { %169 = vmatpush.bf16.msra.mxu0 %v478_v6 }
  0x21   :  { %254 = vmatpush.bf16.msra.mxu1 %v486_v7 }
  0x22   :  { %338 = vmatpush.bf16.msra.mxu2 %v495_v19 }
  0x24   :  { %170 = vmatpush.bf16.msra.mxu0 %v477_v8 }
  0x25   :  { %255 = vmatpush.bf16.msra.mxu1 %v485_v13 }
  0x26   :  { %339 = vmatpush.bf16.msra.mxu2 %v494_v20 }
  0x28   :  { %171 = vmatpush.bf16.msra.mxu0 %v476_v9 }
  0x29   :  { %256 = vmatpush.bf16.msra.mxu1 %v484_v14 }
  0x2a   :  { %340 = vmatpush.bf16.msra.mxu2 %v493_v29 }
  0x2c   :  { %172 = vmatpush.bf16.msra.mxu0 %v475_v10 }
  0x2d   :  { %257 = vmatpush.bf16.msra.mxu1 %v483_v15 }
  0x2e   :  { %341 = vmatpush.bf16.msra.mxu2 %v492_v30 }
  0x30   :  { %173 = vmatpush.bf16.msra.mxu0 %v474_v11 }
  0x31   :  { %258 = vmatpush.bf16.msra.mxu1 %v482_v16 }
  0x32   :  { %342 = vmatpush.bf16.msra.mxu2 %v491_v31 }
  0x33   :  { %174 = vmatmul.bf16.vlgmr.msra.gmra.mxu0 %v473_v12 }
  0x36   :  { %343 = vmatpush.bf16.msra.mxu2 %v490_v32 }
  0xb0   :  { %v175_v21 = vpop.f32.mrf.mxu0 }
  0xb1   :  { %v176_v23 = vadd.f32 %v507_v22, %v175_v21 }
  0xb3   :  { %v180_v26 = vmax.f32 %v176_v23, 0.0 }
  0xb8   :  { %v177_v24 = vpop.f32.mrf.mxu0 }
  0xb9   :  { %v178_v25 = vadd.f32 %v507_v22, %v177_v24 }
  0xbb   :  { %v181_v27 = vmax.f32 %v178_v25, 0.0 }
  0xbd   :  { %v182_v28 = vpack.c.bf16 %v181_v27, %v180_v26 }
  0xbf   :  { %259 = vmatmul.bf16.vlgmr.msra.gmra.mxu1 %v182_v28 }
 0x13c   :  { %v260_v33 = vpop.f32.mrf.mxu1 }
 0x13d   :  { %v261_v35 = vadd.f32 %v508_v34, %v260_v33 }
 0x13f   :  { %v265_v38 = vmax.f32 %v261_v35, 0.0 }
 0x144   :  { %v262_v36 = vpop.f32.mrf.mxu1 }
 0x145   :  { %v263_v37 = vadd.f32 %v508_v34, %v262_v36 }
 0x147   :  { %v266_v39 = vmax.f32 %v263_v37, 0.0 }
 0x149   :  { %v267_v40 = vpack.c.bf16 %v266_v39, %v265_v38 }
 0x14b   :  { %344 = vmatmul.bf16.vlgmr.msra.gmra.mxu2 %v267_v40 }
 0x1ce   :  { %v345_v42 = vpop.f32.mrf.mxu2 }
 0x1cf   :  { %v346_v43 = vadd.f32 %v509_v41, %v345_v42 }
 0x1d1   :  { %350 = vst [vmem:[#allocation10] sm:$0xff] %v346_v43 }
 0x1d6   :  { %v347_v44 = vpop.f32.mrf.mxu2 }
 0x1d7   :  { %v348_v45 = vadd.f32 %v509_v41, %v347_v44 }
 0x1d9   :  { %351 = vst [vmem:[#allocation10 + $0x8] sm:$0xff] %v348_v45 }
 0x1da   :  { %364 = dma.vmem_to_hbm [thread:$0]  %s357_s25, 256, %s359_s4, [#allocation4], %s645_s28, %s645_s28, %s646_s29  }
 0x1db   :  { %636 = dma.done.wait [#allocation4], 256  }
 0x1dc   :  { %637 = vsyncadd [#allocation4], 4294967040 }
 0x1dd   :  { %369 = vsyncpa [#allocation3], 1 }
 0x1de   :  { %370 = vsyncpa [#allocation6], 1 }
 0x1df   :  { %371 = vsyncpa [#allocation9], 1 }
 0x1e0   :  { %372 = vsyncpa [#allocation4], 1 }

// kernel: tpu_custom_call.1
= control target key start
LH: loop header
LB: loop body
LE: loop exit
PB: predicated region body
PF: predicated region fallthrough
CT: control target
= control target key end

     0   :  { %12 = vsyncpa [#allocation3], 0  ;;  %s711_s0 = inlined_call_operand.hbm [shape: bf16[16,128], index: 0, kind: input, shape index: {}]   ;;  %s712_s1 = inlined_call_operand.hbm [shape: bf16[128,128], index: 1, kind: input, shape index: {}]   ;;  %s713_s2 = inlined_call_operand.vmem [shape: f32[1,128], index: 2, kind: input, shape index: {}]   ;;  %s714_s3 = inlined_call_operand.hbm [shape: bf16[128,128], index: 3, kind: input, shape index: {}]   ;;  %s715_s4 = inlined_call_operand.vmem [shape: f32[1,128], index: 4, kind: input, shape index: {}]   ;;  %s716_s5 = inlined_call_operand.hbm [shape: bf16[128,128], index: 5, kind: input, shape index: {}]   ;;  %s717_s6 = inlined_call_operand.vmem [shape: f32[1,128], index: 6, kind: input, shape index: {}]   ;;  %s718_s7 = inlined_call_operand.hbm [shape: f32[16,128], index: 7, kind: output, shape index: {}]  }
   0x1   :  { %13 = vsyncpa [#allocation6], 0 }
   0x2   :  { %14 = vsyncpa [#allocation9], 0 }
   0x3   :  { %15 = vsyncpa [#allocation4], 0  ;;  %s33_s26 = sshll.u32 %s712_s1, 4  ;;  %s638_s27 = smov [#allocation5]   ;;  %s34_s26 = int_to_ptr.hbm [resolvable:$true] %s33_s26 }
   0x4   :  { %s35_s28 = sshll.u32 %s638_s27, 4  ;;  %s20_s8 = sshll.u32 %s711_s0, 4  ;;  %s36_s28 = int_to_ptr.vmem [resolvable:$true] %s35_s28  ;;  %s21_s8 = int_to_ptr.hbm [resolvable:$true] %s20_s8 }
   0x5   :  { %s639_s9 = smov 64   ;;  %s640_s10 = smov 4  }
   0x6   :  { %41 = dma.hbm_to_vmem [thread:$0]  %s34_s26, 1024, %s36_s28, [#allocation6], %s639_s9, %s639_s9, %s640_s10  }
   0x7   :  { %s641_s11 = smov [#allocation2]   ;;  %s48_s15 = sshll.u32 %s714_s3, 4  ;;  %s49_s15 = int_to_ptr.hbm [resolvable:$true] %s48_s15 }
   0x8   :  { %s22_s12 = sshll.u32 %s641_s11, 4  ;;  %s63_s17 = sshll.u32 %s716_s5, 4  ;;  %s23_s12 = int_to_ptr.vmem [resolvable:$true] %s22_s12  ;;  %s64_s17 = int_to_ptr.hbm [resolvable:$true] %s63_s17 }
   0x9   :  { %28 = dma.hbm_to_vmem [thread:$0]  %s21_s8, 128, %s23_s12, [#allocation3], %s639_s9, %s639_s9, %s640_s10  }
   0xa   :  { %s642_s18 = smov [#allocation7]   ;;  %s643_s0 = smov [#allocation8]  }
   0xb   :  { %s50_s19 = sshll.u32 %s642_s18, 4  ;;  %s65_s20 = sshll.u32 %s643_s0, 4  ;;  %s51_s19 = int_to_ptr.vmem [resolvable:$true] %s50_s19  ;;  %s66_s20 = int_to_ptr.vmem [resolvable:$true] %s65_s20 }
   0xc   :  { %56 = dma.hbm_to_vmem [thread:$0]  %s49_s15, 1024, %s51_s19, [#allocation6], %s639_s9, %s639_s9, %s640_s10  }
   0xd   :  { %71 = dma.hbm_to_vmem [thread:$0]  %s64_s17, 1024, %s66_s20, [#allocation9], %s639_s9, %s639_s9, %s640_s10  }
   0xe   :  { %630 = dma.done.wait [#allocation3], 128  }
   0xf   :  { %631 = vsyncadd [#allocation3], 4294967168 }
  0x10   :  { %632 = dma.done.wait [#allocation6], 2048  }
  0x11   :  { %633 = vsyncadd [#allocation6], 4294965248 }
  0x12   :  { %634 = dma.done.wait [#allocation9], 1024  }
  0x13   :  { %635 = vsyncadd [#allocation9], 4294966272  ;;  %v481_v0 = vld [vmem:[#allocation5 + $0x38] sm:$0xff]  ;;  %v480_v1 = vld [vmem:[#allocation5 + $0x30] sm:$0xff]  ;;  %s644_s24 = smov [#allocation10]   ;;  %s645_s28 = smov 128  }
  0x14   :  { %166 = vmatpush.bf16.msra.mxu0 %v481_v0  ;;  %v489_v2 = vld [vmem:[#allocation7 + $0x38] sm:$0xff]  ;;  %v488_v3 = vld [vmem:[#allocation7 + $0x30] sm:$0xff]  ;;  %v479_v4 = vld [vmem:[#allocation5 + $0x28] sm:$0xff]  ;;  %s356_s25 = sshll.u32 %s644_s24, 4  ;;  %s646_s29 = smov 8   ;;  %s357_s25 = int_to_ptr.vmem [resolvable:$true] %s356_s25 }
  0x15   :  { %251 = vmatpush.bf16.msra.mxu1 %v489_v2  ;;  %v487_v5 = vld [vmem:[#allocation7 + $0x28] sm:$0xff]  ;;  %v478_v6 = vld [vmem:[#allocation5 + $0x20] sm:$0xff]  ;;  %v477_v8 = vld [vmem:[#allocation5 + $0x18] sm:$0xff] }
  0x16   :  { %v486_v7 = vld [vmem:[#allocation7 + $0x20] sm:$0xff]  ;;  %v476_v9 = vld [vmem:[#allocation5 + $0x10] sm:$0xff]  ;;  %v475_v10 = vld [vmem:[#allocation5 + $0x8] sm:$0xff] }
  0x17   :  { %v474_v11 = vld [vmem:[#allocation5] sm:$0xff]  ;;  %v473_v12 = vld [vmem:[#allocation2] sm:$0xff]  ;;  %v484_v14 = vld [vmem:[#allocation7 + $0x10] sm:$0xff] }
  0x18   :  { %167 = vmatpush.bf16.msra.mxu0 %v480_v1  ;;  %v485_v13 = vld [vmem:[#allocation7 + $0x18] sm:$0xff]  ;;  %v483_v15 = vld [vmem:[#allocation7 + $0x8] sm:$0xff]  ;;  %v482_v16 = vld [vmem:[#allocation7] sm:$0xff] }
  0x19   :  { %252 = vmatpush.bf16.msra.mxu1 %v488_v3  ;;  %v497_v17 = vld [vmem:[#allocation8 + $0x38] sm:$0xff]  ;;  %v496_v18 = vld [vmem:[#allocation8 + $0x30] sm:$0xff]  ;;  %v495_v19 = vld [vmem:[#allocation8 + $0x28] sm:$0xff] }
  0x1a   :  { %336 = vmatpush.bf16.msra.mxu2 %v497_v17  ;;  %v494_v20 = vld [vmem:[#allocation8 + $0x20] sm:$0xff]  ;;  %v507_v22 = vld [vmem:[%s713_s2] ss:$0 sm:$0xff]  ;;  %v492_v30 = vld [vmem:[#allocation8 + $0x10] sm:$0xff] }
  0x1b   :  { %v493_v29 = vld [vmem:[#allocation8 + $0x18] sm:$0xff]  ;;  %v491_v31 = vld [vmem:[#allocation8 + $0x8] sm:$0xff]  ;;  %v490_v32 = vld [vmem:[#allocation8] sm:$0xff] }
  0x1c   :  { %168 = vmatpush.bf16.msra.mxu0 %v479_v4  ;;  %v508_v34 = vld [vmem:[%s715_s4] ss:$0 sm:$0xff]  ;;  %s358_s4 = sshll.u32 %s718_s7, 4  ;;  %s359_s4 = int_to_ptr.hbm [resolvable:$true] %s358_s4 }
  0x1d   :  { %253 = vmatpush.bf16.msra.mxu1 %v487_v5  ;;  %v509_v41 = vld [vmem:[%s717_s6] ss:$0 sm:$0xff] }
  0x1e   :  { %337 = vmatpush.bf16.msra.mxu2 %v496_v18 }
  0x20   :  { %169 = vmatpush.bf16.msra.mxu0 %v478_v6 }
  0x21   :  { %254 = vmatpush.bf16.msra.mxu1 %v486_v7 }
  0x22   :  { %338 = vmatpush.bf16.msra.mxu2 %v495_v19 }
  0x24   :  { %170 = vmatpush.bf16.msra.mxu0 %v477_v8 }
  0x25   :  { %255 = vmatpush.bf16.msra.mxu1 %v485_v13 }
  0x26   :  { %339 = vmatpush.bf16.msra.mxu2 %v494_v20 }
  0x28   :  { %171 = vmatpush.bf16.msra.mxu0 %v476_v9 }
  0x29   :  { %256 = vmatpush.bf16.msra.mxu1 %v484_v14 }
  0x2a   :  { %340 = vmatpush.bf16.msra.mxu2 %v493_v29 }
  0x2c   :  { %172 = vmatpush.bf16.msra.mxu0 %v475_v10 }
  0x2d   :  { %257 = vmatpush.bf16.msra.mxu1 %v483_v15 }
  0x2e   :  { %341 = vmatpush.bf16.msra.mxu2 %v492_v30 }
  0x30   :  { %173 = vmatpush.bf16.msra.mxu0 %v474_v11 }
  0x31   :  { %258 = vmatpush.bf16.msra.mxu1 %v482_v16 }
  0x32   :  { %342 = vmatpush.bf16.msra.mxu2 %v491_v31 }
  0x33   :  { %174 = vmatmul.bf16.vlgmr.msra.gmra.mxu0 %v473_v12 }
  0x36   :  { %343 = vmatpush.bf16.msra.mxu2 %v490_v32 }
  0xb0   :  { %v175_v21 = vpop.f32.mrf.mxu0 }
  0xb1   :  { %v176_v23 = vadd.f32 %v507_v22, %v175_v21 }
  0xb3   :  { %v180_v26 = vmax.f32 %v176_v23, 0.0 }
  0xb8   :  { %v177_v24 = vpop.f32.mrf.mxu0 }
  0xb9   :  { %v178_v25 = vadd.f32 %v507_v22, %v177_v24 }
  0xbb   :  { %v181_v27 = vmax.f32 %v178_v25, 0.0 }
  0xbd   :  { %v182_v28 = vpack.c.bf16 %v181_v27, %v180_v26 }
  0xbf   :  { %259 = vmatmul.bf16.vlgmr.msra.gmra.mxu1 %v182_v28 }
 0x13c   :  { %v260_v33 = vpop.f32.mrf.mxu1 }
 0x13d   :  { %v261_v35 = vadd.f32 %v508_v34, %v260_v33 }
 0x13f   :  { %v265_v38 = vmax.f32 %v261_v35, 0.0 }
 0x144   :  { %v262_v36 = vpop.f32.mrf.mxu1 }
 0x145   :  { %v263_v37 = vadd.f32 %v508_v34, %v262_v36 }
 0x147   :  { %v266_v39 = vmax.f32 %v263_v37, 0.0 }
 0x149   :  { %v267_v40 = vpack.c.bf16 %v266_v39, %v265_v38 }
 0x14b   :  { %344 = vmatmul.bf16.vlgmr.msra.gmra.mxu2 %v267_v40 }
 0x1ce   :  { %v345_v42 = vpop.f32.mrf.mxu2 }
 0x1cf   :  { %v346_v43 = vadd.f32 %v509_v41, %v345_v42 }
 0x1d1   :  { %350 = vst [vmem:[#allocation10] sm:$0xff] %v346_v43 }
 0x1d6   :  { %v347_v44 = vpop.f32.mrf.mxu2 }
 0x1d7   :  { %v348_v45 = vadd.f32 %v509_v41, %v347_v44 }
 0x1d9   :  { %351 = vst [vmem:[#allocation10 + $0x8] sm:$0xff] %v348_v45 }
 0x1da   :  { %364 = dma.vmem_to_hbm [thread:$0]  %s357_s25, 256, %s359_s4, [#allocation4], %s645_s28, %s645_s28, %s646_s29  }
 0x1db   :  { %636 = dma.done.wait [#allocation4], 256  }
 0x1dc   :  { %637 = vsyncadd [#allocation4], 4294967040 }
 0x1dd   :  { %369 = vsyncpa [#allocation3], 1 }
 0x1de   :  { %370 = vsyncpa [#allocation6], 1 }
 0x1df   :  { %371 = vsyncpa [#allocation9], 1 }
 0x1e0   :  { %372 = vsyncpa [#allocation4], 1 }

</bundles_post_ra>
